<compile_context>
chip_gen: v7x
topology: tpu7x:2x2x1
jax: 0.10.0
libtpu: 0.0.40
codegen_flags: <defaults>
</compile_context>

<pallas_src>
import functools
import math

import jax
import jax.numpy as jnp
from jax.experimental import pallas as pl
from jax.experimental.pallas import tpu as pltpu

BN_EPS = 1e-5
BN_SCALE = 1.0 / math.sqrt(1.0 + BN_EPS)   # gamma=1, beta=0, mean=0, var=1 (eval mode)


def _round_up(x, m):
    return ((x + m - 1) // m) * m


# ----------------------------------------------------------------------------- #
# Pallas GEMM kernel: out = maybe_relu((A @ B) * scale + shift)
#   A: (M, K) bf16, B: (K, N) bf16, scale/shift: (1, N) f32 broadcast over rows.
#   Full-K blocks -> single dot per output tile, no accumulator scratch needed.
# ----------------------------------------------------------------------------- #
def _mm_affine_kernel(a_ref, b_ref, s_ref, t_ref, o_ref, *, relu):
    acc = jnp.dot(a_ref[...], b_ref[...], preferred_element_type=jnp.float32)
    y = acc * s_ref[...] + t_ref[...]
    if relu:
        y = jnp.maximum(y, 0.0)
    o_ref[...] = y.astype(o_ref.dtype)


@functools.partial(jax.jit, static_argnames=("relu", "out_dtype"))
def matmul_affine(a, b, scale, shift, relu=False, out_dtype=jnp.bfloat16):
    """maybe_relu((a @ b) * scale + shift); scale/shift broadcast over columns."""
    M, K = a.shape
    N = b.shape[1]
    a = a.astype(jnp.bfloat16)
    b = b.astype(jnp.bfloat16)
    scale = scale.astype(jnp.float32).reshape(1, N)
    shift = shift.astype(jnp.float32).reshape(1, N)

    # Row (M) tiling: multiples of 16 (bf16 sublane packing), cap at 512 rows.
    if M <= 512:
        tm = _round_up(M, 16)
        Mp = tm
    else:
        tm = 512
        Mp = _round_up(M, tm)
    # Column (N) tiling: keep the true N when narrow (lane-dense masked stores
    # instead of writing a 128-padded output back to HBM).
    if N <= 512:
        tn, Np = N, N
    elif N % 256 == 0:
        tn, Np = 256, N
    else:
        tn = 128
        Np = _round_up(N, 128)

    if Mp != M:
        a = jnp.pad(a, ((0, Mp - M), (0, 0)))
    if Np != N:
        b = jnp.pad(b, ((0, 0), (0, Np - N)))
        scale = jnp.pad(scale, ((0, 0), (0, Np - N)))
        shift = jnp.pad(shift, ((0, 0), (0, Np - N)))

    grid = (Mp // tm, Np // tn)
    out = pl.pallas_call(
        functools.partial(_mm_affine_kernel, relu=relu),
        out_shape=jax.ShapeDtypeStruct((Mp, Np), out_dtype),
        grid=grid,
        in_specs=[
            pl.BlockSpec((tm, K), lambda i, j: (i, 0)),
            pl.BlockSpec((K, tn), lambda i, j: (0, j)),
            pl.BlockSpec((1, tn), lambda i, j: (0, j)),
            pl.BlockSpec((1, tn), lambda i, j: (0, j)),
        ],
        out_specs=pl.BlockSpec((tm, tn), lambda i, j: (i, j)),
        compiler_params=pltpu.CompilerParams(
            dimension_semantics=("parallel", "parallel"),
            vmem_limit_bytes=32 * 1024 * 1024,
        ),
    )(a, b, scale, shift)
    if Mp != M or Np != N:
        out = out[:M, :N]
    return out


# ----------------------------------------------------------------------------- #
# Conv / linear wrappers (im2col in JAX, GEMM in Pallas).
# ----------------------------------------------------------------------------- #
def conv2d(x, w, *, bias=None, bn=False, relu=False, padding=(0, 0), dilation=(1, 1),
           out_dtype=jnp.bfloat16):
    """x: (N,H,W,Cin) NHWC bf16, w: (kh,kw,Cin,Cout); stride 1."""
    x = x.astype(jnp.bfloat16)
    N, H, W, Cin = x.shape
    kh, kw, _, Cout = w.shape
    ph, pw = padding
    dh, dw = dilation
    xp = jnp.pad(x, ((0, 0), (ph, ph), (pw, pw), (0, 0))) if (ph or pw) else x
    Hout = H + 2 * ph - dh * (kh - 1)
    Wout = W + 2 * pw - dw * (kw - 1)
    if kh == 1 and kw == 1:
        patches = xp
    else:
        cols = [xp[:, i * dh:i * dh + Hout, j * dw:j * dw + Wout, :]
                for i in range(kh) for j in range(kw)]
        patches = jnp.concatenate(cols, axis=-1)
    A = patches.reshape(N * Hout * Wout, kh * kw * Cin)
    B = w.reshape(kh * kw * Cin, Cout)
    scale = jnp.ones((Cout,), jnp.float32)
    shift = bias.astype(jnp.float32) if bias is not None else jnp.zeros((Cout,), jnp.float32)
    if bn:  # fold eval-mode BatchNorm (gamma=1, beta=0, mean=0, var=1)
        scale = scale * BN_SCALE
        shift = shift * BN_SCALE
    out = matmul_affine(A, B, scale, shift, relu=relu, out_dtype=out_dtype)
    return out.reshape(N, Hout, Wout, Cout)


def linear(p, x, out_dtype=jnp.float32):
    d_in = x.shape[-1]
    d_out = p["w"].shape[1]
    x2 = x.reshape(-1, d_in)
    if x2.shape[0] < 16:
        # Tiny token-side GEMM (M = batch*token_len = 8): kernel-launch + row-padding
        # overhead dominates any MXU benefit, keep it in plain JAX (per perf review).
        y = jnp.dot(x2.astype(jnp.float32), p["w"].astype(jnp.float32))
        if p["b"] is not None:
            y = y + p["b"]
    else:
        shift = p["b"] if p["b"] is not None else jnp.zeros((d_out,), jnp.float32)
        y = matmul_affine(x2, p["w"], jnp.ones((d_out,), jnp.float32), shift,
                          relu=False, out_dtype=out_dtype)
    return y.reshape(*x.shape[:-1], d_out).astype(out_dtype)


# ----------------------------------------------------------------------------- #
# Small glue ops (plain JAX) — tiny attention, norms, resampling.
# ----------------------------------------------------------------------------- #
def mha_plain(q, k, v, heads, scale):
    """Multi-head attention for this model's tiny shapes (4 tokens / dim_head 1)."""
    b, n, inner = q.shape
    m = k.shape[1]
    d = inner // heads
    qh = q.reshape(b, n, heads, d).astype(jnp.float32)
    kh = k.reshape(b, m, heads, d).astype(jnp.float32)
    vh = v.reshape(b, m, heads, d).astype(jnp.float32)
    s = jnp.einsum("bnhd,bmhd->bhnm", qh, kh) * scale
    p = jax.nn.softmax(s, axis=-1)
    o = jnp.einsum("bhnm,bmhd->bnhd", p, vh)
    return o.reshape(b, n, inner)


def layer_norm(x, eps=1e-5):   # LayerNorm with default init (weight=1, bias=0)
    x = x.astype(jnp.float32)
    mu = jnp.mean(x, axis=-1, keepdims=True)
    var = jnp.mean((x - mu) ** 2, axis=-1, keepdims=True)
    return (x - mu) * jax.lax.rsqrt(var + eps)


def adaptive_avg_pool2d(x, out_size):
    N, H, W, C = x.shape
    if H == out_size and W == out_size:
        return x
    # TODO(synk): general (non-divisible) AdaptiveAvgPool2d not implemented; the
    # module only ever pools H -> H/2 here.
    fh, fw = H // out_size, W // out_size
    return x.reshape(N, out_size, fh, out_size, fw, C).mean(axis=(2, 4))


def upsample_bilinear(x, factor):
    # half-pixel convention ~ nn.Upsample(mode='bilinear', align_corners=False)
    N, H, W, C = x.shape
    y = jax.image.resize(x, (N, H * factor, W * factor, C), method="bilinear")
    return y.astype(x.dtype)


# ----------------------------------------------------------------------------- #
# Parameter construction (deterministic, synthetic).
# ----------------------------------------------------------------------------- #
class KeyGen:
    def __init__(self, seed):
        self.key = jax.random.PRNGKey(seed)

    def __call__(self):
        self.key, k = jax.random.split(self.key)
        return k


def init_conv(kg, kh, kw, cin, cout, bias=True):
    fan_out = kh * kw * cout
    w = jax.random.normal(kg(), (kh, kw, cin, cout), jnp.float32) * math.sqrt(2.0 / fan_out)
    return {"w": w, "b": jnp.zeros((cout,), jnp.float32) if bias else None}


def init_linear(kg, din, dout, bias=True):
    w = jax.random.normal(kg(), (din, dout), jnp.float32) * (1.0 / math.sqrt(din))
    return {"w": w, "b": jnp.zeros((dout,), jnp.float32) if bias else None}


def init_fec(kg, cin, cmid, cout):
    return {"conv1": init_conv(kg, 3, 3, cin, cmid, True),
            "conv2": init_conv(kg, 1, 1, cmid, cout, False)}


def init_rfb(kg, cin, cout=32):
    return {
        "b0": init_conv(kg, 1, 1, cin, cout, False),
        "b1_0": init_conv(kg, 1, 1, cin, cout, False),
        "b1_1": init_conv(kg, 1, 3, cout, cout, False),
        "b1_2": init_conv(kg, 3, 1, cout, cout, False),
        "b1_3": init_conv(kg, 3, 3, cout, cout, False),
        "b2_0": init_conv(kg, 1, 1, cin, cout, False),
        "b2_1": init_conv(kg, 1, 5, cout, cout, False),
        "b2_2": init_conv(kg, 5, 1, cout, cout, False),
        "b2_3": init_conv(kg, 3, 3, cout, cout, False),
        # branch3 exists in the PyTorch module but is unused in forward(); omitted.
        "cat": init_conv(kg, 3, 3, 3 * cout, cout, False),
        "res": init_conv(kg, 1, 1, cin, cout, False),
    }


def init_token_encoder(kg, in_chan=64, token_len=4, heads=8, dim_head=64, mlp_dim=64):
    inner = heads * dim_head
    return {
        "conv_a": init_conv(kg, 1, 1, in_chan, token_len, True),
        "pos": jax.random.normal(kg(), (1, token_len, in_chan), jnp.float32),
        "attn_qkv": init_linear(kg, in_chan, inner * 3, bias=False),
        "attn_out": init_linear(kg, inner, in_chan, bias=True),
        "ff1": init_linear(kg, in_chan, mlp_dim),
        "ff2": init_linear(kg, mlp_dim, in_chan),
    }


def init_token_decoder(kg, in_chan=64, size=16, heads=8, dim_head=1, mlp_dim=128):
    inner = heads * dim_head   # dim_head=True in PyTorch -> 1 per head -> inner=8
    return {
        "pos": jax.random.normal(kg(), (2, size, size, in_chan), jnp.float32),
        "to_q": init_linear(kg, in_chan, inner, bias=False),
        "to_k": init_linear(kg, in_chan, inner, bias=False),
        "to_v": init_linear(kg, in_chan, inner, bias=False),
        "to_out": init_linear(kg, inner, in_chan, bias=True),
        "ff1": init_linear(kg, in_chan, mlp_dim),
        "ff2": init_linear(kg, mlp_dim, in_chan),
    }


def init_ca(kg, in_chan, size):
    return {"enc": init_token_encoder(kg, in_chan, 4, 8, 64, 64),
            "dec": init_token_decoder(kg, 64, size, 8, 1, 128)}


def init_feblock1(kg, patch=32):
    n1 = 40
    f = [n1, n1 * 2, n1 * 4, n1 * 8, n1 * 16]
    return {
        "conv0_0": init_conv(kg, 5, 5, 3, f[0], True),
        "conv0": init_fec(kg, f[0], f[0], f[0]),
        "conv2": init_fec(kg, f[0], f[1], f[1]),
        "conv4": init_fec(kg, f[1], f[2], f[2]),
        "conv5": init_fec(kg, f[2], f[3], f[3]),
        "conv6_4": init_conv(kg, 1, 1, 64, f[1], True),
        "conv7_4": init_conv(kg, 3, 3, f[1], 2, False),
        "conv6_3": init_conv(kg, 1, 1, 128, f[1], True),
        "conv7_3": init_conv(kg, 3, 3, f[1], 2, False),
        "conv6_2": init_conv(kg, 1, 1, 192, f[1], True),
        "conv7_2": init_conv(kg, 3, 3, f[1], 2, False),
        "rfb2_1": init_rfb(kg, f[1], 32),
        "rfb3_1": init_rfb(kg, f[2], 32),
        "rfb4_1": init_rfb(kg, f[3], 32),
        "CA_s4": init_ca(kg, 64, patch // 2),
        "CA_s8": init_ca(kg, 64, patch // 4),
        "CA_s16": init_ca(kg, 64, patch // 8),
    }


# ----------------------------------------------------------------------------- #
# Sub-module forwards.
# ----------------------------------------------------------------------------- #
def fec_forward(p, x):
    identity = conv2d(x, p["conv1"]["w"], bias=p["conv1"]["b"], padding=(1, 1))
    z = jnp.maximum(identity * BN_SCALE, 0.0)          # bn1 (folded) + ReLU
    z = conv2d(z, p["conv2"]["w"], bn=True)             # conv2 + bn2
    return jnp.maximum(z + identity, 0.0)               # residual uses pre-bn1 conv1 out


def rfb_forward(p, x):
    cout = p["b0"]["w"].shape[-1]
    bc = lambda pp, xx, pad, dil=(1, 1): conv2d(xx, pp["w"], bn=True, padding=pad, dilation=dil)
    # Fuse the four 1x1 BasicConv2d layers that all read x (b0, b1_0, b2_0, res):
    # one GEMM with 4*32 = 128 output lanes fills the lane dimension exactly.
    w1 = jnp.concatenate([p["b0"]["w"], p["b1_0"]["w"], p["b2_0"]["w"], p["res"]["w"]], axis=-1)
    y = conv2d(x, w1, bn=True)
    x0 = y[..., 0 * cout:1 * cout]
    x1 = y[..., 1 * cout:2 * cout]
    x2 = y[..., 2 * cout:3 * cout]
    x_res = y[..., 3 * cout:4 * cout]
    x1 = bc(p["b1_1"], x1, (0, 1))
    x1 = bc(p["b1_2"], x1, (1, 0))
    x1 = bc(p["b1_3"], x1, (3, 3), (3, 3))
    x2 = bc(p["b2_1"], x2, (0, 2))
    x2 = bc(p["b2_2"], x2, (2, 0))
    x2 = bc(p["b2_3"], x2, (5, 5), (5, 5))
    x_cat = bc(p["cat"], jnp.concatenate([x0, x1, x2], axis=-1), (1, 1))
    return jnp.maximum(x_cat + x_res, 0.0)


def token_encoder_forward(p, x, token_len=4, heads=8):
    b, h, w, c = x.shape
    sa = conv2d(x, p["conv_a"]["w"], bias=p["conv_a"]["b"])                  # (b,h,w,L)
    sa = sa.reshape(b, h * w, token_len).transpose(0, 2, 1)                  # (b,L,hw)
    sa = jax.nn.softmax(sa.astype(jnp.float32), axis=-1)
    xf = x.reshape(b, h * w, c).astype(jnp.float32)
    tokens = jnp.einsum("bln,bnc->blc", sa, xf)                              # (b,L,c) tiny
    tokens = tokens + p["pos"]
    # Transformer (depth=1): x + Attn(LN(x)); x + FF(LN(x))
    xn = layer_norm(tokens)
    qkv = linear(p["attn_qkv"], xn)
    q, k, v = jnp.split(qkv, 3, axis=-1)
    att = mha_plain(q, k, v, heads=heads, scale=float(c) ** -0.5)
    tokens = tokens + linear(p["attn_out"], att)
    yn = layer_norm(tokens)
    y = linear(p["ff2"], jax.nn.gelu(linear(p["ff1"], yn), approximate=False))
    return tokens + y


def token_decoder_forward(p, x, m, heads=8):
    b, h, w, c = x.shape
    xs = (x.astype(jnp.float32) + p["pos"]).reshape(b, h * w, c)
    # TransformerDecoder (depth=1): x + CrossAttn(LN(x), LN(m)); x + FF(LN(x))
    xn = layer_norm(xs)
    mn = layer_norm(m)
    q = linear(p["to_q"], xn)
    k = linear(p["to_k"], mn)
    v = linear(p["to_v"], mn)
    att = mha_plain(q, k, v, heads=heads, scale=float(c) ** -0.5)
    xs = xs + linear(p["to_out"], att)
    yn = layer_norm(xs)
    xs = xs + linear(p["ff2"], jax.nn.gelu(linear(p["ff1"], yn), approximate=False))
    return xs.reshape(b, h, w, c)


def context_aggregator_forward(p, feat):
    tokens = token_encoder_forward(p["enc"], feat)
    return token_decoder_forward(p["dec"], feat, tokens)


# ----------------------------------------------------------------------------- #
# FEBlock1 forward.
# ----------------------------------------------------------------------------- #
@jax.jit
def feblock1_forward(P, x1_nchw, x2_nchw):
    x1 = jnp.transpose(x1_nchw, (0, 2, 3, 1)).astype(jnp.bfloat16)   # NCHW -> NHWC
    x2 = jnp.transpose(x2_nchw, (0, 2, 3, 1)).astype(jnp.bfloat16)
    B = x1.shape[0]

    # Siamese stem + RFB: run both temporal inputs through the shared weights in
    # one batched pass (halves kernel launches vs. two passes).
    xx = jnp.concatenate([x1, x2], axis=0)
    y = conv2d(xx, P["conv0_0"]["w"], bias=P["conv0_0"]["b"], padding=(2, 2))
    y = fec_forward(P["conv0"], y)
    a = fec_forward(P["conv2"], adaptive_avg_pool2d(y, y.shape[1] // 2))
    b = fec_forward(P["conv4"], adaptive_avg_pool2d(a, a.shape[1] // 2))
    c = fec_forward(P["conv5"], adaptive_avg_pool2d(b, b.shape[1] // 2))

    a_rfb = rfb_forward(P["rfb2_1"], a)     # holds x3_rfb | x5_rfb along batch
    b_rfb = rfb_forward(P["rfb3_1"], b)     # x4_rfb | x6_rfb
    c_rfb = rfb_forward(P["rfb4_1"], c)     # A_F4_rfb | A_F8_rfb

    s1 = context_aggregator_forward(
        P["CA_s4"], jnp.concatenate([a_rfb[:B], a_rfb[B:]], -1)).astype(jnp.bfloat16)
    s2 = context_aggregator_forward(
        P["CA_s8"], jnp.concatenate([b_rfb[:B], b_rfb[B:]], -1)).astype(jnp.bfloat16)
    s4 = context_aggregator_forward(
        P["CA_s16"], jnp.concatenate([c_rfb[:B], c_rfb[B:]], -1)).astype(jnp.bfloat16)

    c4 = s4
    c3 = jnp.concatenate([s2, upsample_bilinear(c4, 2)], -1)
    c2 = jnp.concatenate([s1, upsample_bilinear(c3, 2)], -1)

    c4u = conv2d(upsample_bilinear(c4, 8), P["conv6_4"]["w"], bias=P["conv6_4"]["b"])
    out4 = conv2d(c4u, P["conv7_4"]["w"], padding=(1, 1))
    c3u = conv2d(upsample_bilinear(c3, 4), P["conv6_3"]["w"], bias=P["conv6_3"]["b"])
    out3 = conv2d(c3u, P["conv7_3"]["w"], padding=(1, 1))
    c2u = conv2d(upsample_bilinear(c2, 2), P["conv6_2"]["w"], bias=P["conv6_2"]["b"])
    out2 = conv2d(c2u, P["conv7_2"]["w"], padding=(1, 1))

    to_nchw = lambda t: jnp.transpose(t.astype(jnp.float32), (0, 3, 1, 2))
    return ((to_nchw(out2),), (to_nchw(out3),), (to_nchw(out4),))


# ----------------------------------------------------------------------------- #
if __name__ == "__main__":
    # Scaled-down test configuration: the reference defaults to patch_size=256 with
    # hard-coded pool/CA sizes 128/64/32; here every stage is scaled by the same
    # factor (patch=32 -> pools/CA at 16/8/4) so the forward graph is structurally
    # identical but small enough to compile and run quickly.  Batch must be 2
    # (pos_embedding_decoder has a hard batch dim of 2).
    PATCH = 32
    k_in1, k_in2 = jax.random.split(jax.random.PRNGKey(0))
    x1 = jax.random.normal(k_in1, (2, 3, PATCH, PATCH), jnp.float32)
    x2 = jax.random.normal(k_in2, (2, 3, PATCH, PATCH), jnp.float32)

    params = init_feblock1(KeyGen(42), patch=PATCH)

    (out2,), (out3,), (out4,) = feblock1_forward(params, x1, x2)
    jax.block_until_ready((out2, out3, out4))

    assert out2.shape == (2, 2, PATCH, PATCH), out2.shape
    assert out3.shape == (2, 2, PATCH, PATCH), out3.shape
    assert out4.shape == (2, 2, PATCH, PATCH), out4.shape
    assert bool(jnp.all(jnp.isfinite(out2)))
    assert bool(jnp.all(jnp.isfinite(out3)))
    assert bool(jnp.all(jnp.isfinite(out4)))
    print("KERNEL_OK")
</pallas_src>

<mosaic_0001>
module attributes {stable_mosaic.version = 11 : i64} {
  func.func @_mm_affine_kernel(%arg0: i32, %arg1: i32, %arg2: memref<512x75xbf16, #tpu.memory_space<vmem>>, %arg3: memref<75x40xbf16, #tpu.memory_space<vmem>>, %arg4: memref<1x40xf32, #tpu.memory_space<vmem>>, %arg5: memref<1x40xf32, #tpu.memory_space<vmem>>, %arg6: memref<512x40xbf16, #tpu.memory_space<vmem>>) attributes {dimension_semantics = [#tpu.dimension_semantics<parallel>, #tpu.dimension_semantics<parallel>], iteration_bounds = array<i64: 8, 1>, scalar_prefetch = 0 : i64, scratch_operands = 0 : i64, tpu.core_type = #tpu.core_type<tc>, window_params = [{transform_indices = @transform_0, window_bounds = array<i64: 512, 75>}, {transform_indices = @transform_1, window_bounds = array<i64: 75, 40>}, {transform_indices = @transform_2, window_bounds = array<i64: 1, 40>}, {transform_indices = @transform_3, window_bounds = array<i64: 1, 40>}, {transform_indices = @transform_4, window_bounds = array<i64: 512, 40>}]} {
    %c0 = arith.constant 0 : index
    %c0_0 = arith.constant 0 : index
    %0 = vector.load %arg2[%c0, %c0_0] : memref<512x75xbf16, #tpu.memory_space<vmem>>, vector<512x75xbf16>
    %c0_1 = arith.constant 0 : index
    %c0_2 = arith.constant 0 : index
    %1 = vector.load %arg3[%c0_1, %c0_2] : memref<75x40xbf16, #tpu.memory_space<vmem>>, vector<75x40xbf16>
    %cst = arith.constant dense<0.000000e+00> : vector<512x40xf32>
    %2 = tpu.matmul %0, %1, %cst {dimension_numbers = #tpu.dot_dimension_numbers<[1], [0], [0], [1], [0, 0, 1, 1], [], []>} : vector<512x75xbf16>, vector<75x40xbf16>, vector<512x40xf32> -> vector<512x40xf32>
    %c0_3 = arith.constant 0 : index
    %c0_4 = arith.constant 0 : index
    %3 = vector.load %arg4[%c0_3, %c0_4] : memref<1x40xf32, #tpu.memory_space<vmem>>, vector<1x40xf32>
    %4 = vector.broadcast %3 : vector<1x40xf32> to vector<512x40xf32>
    %5 = arith.mulf %2, %4 : vector<512x40xf32>
    %c0_5 = arith.constant 0 : index
    %c0_6 = arith.constant 0 : index
    %6 = vector.load %arg5[%c0_5, %c0_6] : memref<1x40xf32, #tpu.memory_space<vmem>>, vector<1x40xf32>
    %7 = vector.broadcast %6 : vector<1x40xf32> to vector<512x40xf32>
    %8 = arith.addf %5, %7 : vector<512x40xf32>
    %9 = arith.truncf %8 : vector<512x40xf32> to vector<512x40xbf16>
    %c0_7 = arith.constant 0 : index
    %c0_8 = arith.constant 0 : index
    %10 = vector.load %arg6[%c0_7, %c0_8] : memref<512x40xbf16, #tpu.memory_space<vmem>>, vector<512x40xbf16>
    tpu.vector_store %arg6[%c0_7, %c0_8], %9 {strides = array<i32>} : memref<512x40xbf16, #tpu.memory_space<vmem>>, vector<512x40xbf16>,
    return
  }
  func.func @transform_0(%arg0: i32, %arg1: i32) -> (i32, i32) {
    %c0_i32 = arith.constant 0 : i32
    %c0_i32_0 = arith.constant 0 : i32
    return %arg0, %c0_i32 : i32, i32
  }
  func.func @transform_1(%arg0: i32, %arg1: i32) -> (i32, i32) {
    %c0_i32 = arith.constant 0 : i32
    %c0_i32_0 = arith.constant 0 : i32
    return %c0_i32, %arg1 : i32, i32
  }
  func.func @transform_2(%arg0: i32, %arg1: i32) -> (i32, i32) {
    %c0_i32 = arith.constant 0 : i32
    %c0_i32_0 = arith.constant 0 : i32
    return %c0_i32, %arg1 : i32, i32
  }
  func.func @transform_3(%arg0: i32, %arg1: i32) -> (i32, i32) {
    %c0_i32 = arith.constant 0 : i32
    %c0_i32_0 = arith.constant 0 : i32
    return %c0_i32, %arg1 : i32, i32
  }
  func.func @transform_4(%arg0: i32, %arg1: i32) -> (i32, i32) {
    %c0_i32 = arith.constant 0 : i32
    return %arg0, %arg1 : i32, i32
  }
}

</mosaic_0001>

<bundles_post_ra>
// kernel: matmul_affine.1
= control target key start
LH: loop header
LB: loop body
LE: loop exit
PB: predicated region body
PF: predicated region fallthrough
CT: control target
= control target key end

     0   :  { %s1946_s15 = smov 0   ;;  %s1948_s16 = smov 0   ;;  %s2338_s0 = inlined_call_operand.vmem [shape: bf16[4096,75], index: 0, kind: input, shape index: {}]   ;;  %s2339_s1 = inlined_call_operand.vmem [shape: bf16[75,40], index: 1, kind: input, shape index: {}]   ;;  %s2340_s2 = inlined_call_operand.vmem [shape: f32[1,40], index: 2, kind: input, shape index: {}]   ;;  %s2341_s3 = inlined_call_operand.vmem [shape: f32[1,40], index: 3, kind: input, shape index: {}]   ;;  %s2342_s4 = inlined_call_operand.vmem [shape: bf16[4096,40], index: 4, kind: output, shape index: {}]  }
   0x1   :  { %s1950_s17 = smov 0  }
   0x2 LB: > { %s26_s18 = sadd.s32 1, %s1914_s16  ;;  %p1507_p0 = scmp.ge.s32.totalorder %s1918_s17, 1  ;;  %s1918_s17 = sphi %s1950_s17, %s14_s17   ;;  %s1914_s16 = sphi %s1948_s16, %s2344_s16   ;;  %s1910_s15 = sphi %s1946_s15, %s2343_s15  }
   0x3   : > { %p28_p1 = scmp.ge.s32.totalorder %s26_s18, 8  ;;  %p202_p2 = scmp.lt.s32.totalorder %s1918_s17, 9 }
   0x5   : > { %s2346_s18 = smov (%p28_p1, %s26_s18), 0  ;;  %p203_p3 = pnand %p1507_p0, %p202_p2 }
   0x6   : > { %v1859_v0 = vld [vmem:[%s2339_s1] sm:$0xff] (!%p203_p3)   ;;  %v1860_v1 = vld [vmem:[%s2339_s1 + $0x8] sm:$0xff] (!%p203_p3)   ;;  %vm627_vm0 = vcmask (!%p203_p3), 1044480   ;;  %v1861_v2 = vld [vmem:[%s2339_s1 + $0x10] sm:$0xff] (!%p203_p3)   ;;  %s1508_s25 = sshll.u32 (!%p203_p3), %s1910_s15, 6  ;;  %vm628_vm1 = vcmask (!%p203_p3), 1045504  }
   0x7   : > { %206 = sbr.rel (%p203_p3) target bundleno = 305 (0x131), region = 36  ;;  %1750 = vmatprep.subr.bf16.mxu0 (!%p203_p3), %v1859_v0  ;;  %1824 = vmatprep.subr.bf16.mxu1 (!%p203_p3), %v1859_v0  ;;  %v1920_v3 = vmov (!%p203_p3), 65535   ;;  %p242_p4 = scmp.lt.s32.totalorder (!%p203_p3), %s1508_s25, 511  ;;  %v1862_v5 = vld [vmem:[%s2339_s1 + $0x18] sm:$0xff] (!%p203_p3)   ;;  %v1863_v6 = vld [vmem:[%s2339_s1 + $0x20] sm:$0x3f] (!%p203_p3)  }
   0x8   : > { %1751 = vmatpush3.bf16.msra.mxu0 (!%p203_p3), %v1859_v0  ;;  %1829 = vmatpush3.bf16.msra.mxu1 (!%p203_p3), %v1859_v0  ;;  %v629_v4 = vsel (!%p203_p3), %vm627_vm0, 4294967295, %v1920_v3  ;;  %vm530_vm2 = vcmask (!%p203_p3), 613376   ;;  %v2059_v41 = vld [vmem:[%s2340_s2] ss:$0 sm:$0xff] (!%p203_p3)  ;;  %vm1321_vm3 = vcmask (!%p203_p3), 322560  }
   0x9   : > { %1752 = vmatprep.subr.bf16.mxu0 (!%p203_p3), %v1860_v1  ;;  %1825 = vmatprep.subr.bf16.mxu1 (!%p203_p3), %v1860_v1  ;;  %v630_v7 = vsel (!%p203_p3), %vm628_vm1, %v629_v4, 0  ;;  %v2064_v43 = vld [vmem:[%s2341_s3] ss:$0 sm:$0xff] (!%p203_p3) }
   0xa   : > { %v632_v8 = vand.u32 (!%p203_p3), %v1863_v6, %v630_v7 }
   0xc   : > { %1753 = vmatpush3.bf16.msra.mxu0 (!%p203_p3), %v1860_v1  ;;  %1830 = vmatpush3.bf16.msra.mxu1 (!%p203_p3), %v1860_v1 }
   0xd   : > { %1754 = vmatprep.subr.bf16.mxu0 (!%p203_p3), %v1861_v2  ;;  %1826 = vmatprep.subr.bf16.mxu1 (!%p203_p3), %v1861_v2 }
   0xe   : > { %s2348_s25 = smov (!%p242_p4, %s1508_s25), 511 }
   0xf   : > { %s1509_s30 = sshll.u32 %s2348_s25, 2 }
  0x10   : > { %1755 = vmatpush3.bf16.msra.mxu0 %v1861_v2  ;;  %1831 = vmatpush3.bf16.msra.mxu1 %v1861_v2  ;;  %s1990_s7 = scalar_lea.vmem %s2338_s0, %s1509_s30  ;;  %s2079_s14 = scalar_lea.vmem %s2342_s4, %s1509_s30 }
  0x11   : > { %1756 = vmatprep.subr.bf16.mxu0 %v1862_v5  ;;  %1827 = vmatprep.subr.bf16.mxu1 %v1862_v5  ;;  %v1864_v9 = vld [vmem:[%s1990_s7] sm:$0xff]   ;;  %v1866_v11 = vld [vmem:[%s1990_s7 + $0x8] sm:$0xff]   ;;  %v1868_v13 = vld [vmem:[%s1990_s7 + $0x10] sm:$0xff]  }
  0x12   : > { %v1865_v10 = vld [vmem:[%s1990_s7 + $0x80] sm:$0xff]   ;;  %1760 = vmatprep.mubr.msk.bf16.mxu0 %vm530_vm2, %v1864_v9  ;;  %v1867_v12 = vld [vmem:[%s1990_s7 + $0x88] sm:$0xff]   ;;  %v1869_v14 = vld [vmem:[%s1990_s7 + $0x90] sm:$0xff]  }
  0x13   : > { %1792 = vmatprep.mubr.msk.bf16.mxu1 %vm530_vm2, %v1865_v10  ;;  %v1870_v15 = vld [vmem:[%s1990_s7 + $0x18] sm:$0xff]   ;;  %v1872_v17 = vld [vmem:[%s1990_s7 + $0x20] sm:$0xff]   ;;  %v1874_v19 = vld [vmem:[%s1990_s7 + $0x28] sm:$0xff]  }
  0x14   : > { %1757 = vmatpush3.bf16.msra.mxu0 %v1862_v5  ;;  %1832 = vmatpush3.bf16.msra.mxu1 %v1862_v5  ;;  %v1871_v16 = vld [vmem:[%s1990_s7 + $0x98] sm:$0xff]   ;;  %v1873_v18 = vld [vmem:[%s1990_s7 + $0xa0] sm:$0xff]   ;;  %v1875_v20 = vld [vmem:[%s1990_s7 + $0xa8] sm:$0xff]  }
  0x15   : > { %1758 = vmatprep.subr.bf16.mxu0 %v632_v8  ;;  %1828 = vmatprep.subr.bf16.mxu1 %v632_v8  ;;  %v1876_v21 = vld [vmem:[%s1990_s7 + $0x30] sm:$0xff]   ;;  %v1878_v23 = vld [vmem:[%s1990_s7 + $0x38] sm:$0xff]   ;;  %v1880_v25 = vld [vmem:[%s1990_s7 + $0x40] sm:$0xff]  }
  0x16   : > { %v1877_v22 = vld [vmem:[%s1990_s7 + $0xb0] sm:$0xff]   ;;  %v1879_v24 = vld [vmem:[%s1990_s7 + $0xb8] sm:$0xff]   ;;  %v1881_v26 = vld [vmem:[%s1990_s7 + $0xc0] sm:$0xff]  }
  0x17   : > { %v1882_v27 = vld [vmem:[%s1990_s7 + $0x48] sm:$0xff]   ;;  %v1884_v29 = vld [vmem:[%s1990_s7 + $0x50] sm:$0xff]   ;;  %v1886_v31 = vld [vmem:[%s1990_s7 + $0x58] sm:$0xff]  }
  0x18   : > { %1759 = vmatpush3.bf16.msra.mxu0 %v632_v8  ;;  %1833 = vmatpush3.bf16.msra.mxu1 %v632_v8  ;;  %v1883_v28 = vld [vmem:[%s1990_s7 + $0xc8] sm:$0xff]   ;;  %v1885_v30 = vld [vmem:[%s1990_s7 + $0xd0] sm:$0xff]   ;;  %v1887_v32 = vld [vmem:[%s1990_s7 + $0xd8] sm:$0xff]  }
  0x19   : > { %v1888_v33 = vld [vmem:[%s1990_s7 + $0x60] sm:$0xff]   ;;  %v1890_v35 = vld [vmem:[%s1990_s7 + $0x68] sm:$0xff]   ;;  %v1892_v37 = vld [vmem:[%s1990_s7 + $0x70] sm:$0xff]  }
  0x1a   : > { %v1889_v34 = vld [vmem:[%s1990_s7 + $0xe0] sm:$0xff]   ;;  %v1891_v36 = vld [vmem:[%s1990_s7 + $0xe8] sm:$0xff]   ;;  %v1893_v38 = vld [vmem:[%s1990_s7 + $0xf0] sm:$0xff]  }
  0x1b   : > { %1761 = vmatmul.mubr.msk.bf16.vlgmr.msra.gmra.mrb[0].mxu0 %vm530_vm2, %v1866_v11  ;;  %1793 = vmatmul.mubr.msk.bf16.vlgmr.msra.gmra.mrb[0].mxu1 %vm530_vm2, %v1867_v12  ;;  %v1894_v39 = vld [vmem:[%s1990_s7 + $0x78] sm:$0xff]  }
  0x1c   : > { %1764 = vmatprep.mubr.msk.bf16.mxu0 %vm530_vm2, %v1868_v13  ;;  %1796 = vmatprep.mubr.msk.bf16.mxu1 %vm530_vm2, %v1869_v14  ;;  %v1895_v40 = vld [vmem:[%s1990_s7 + $0xf8] sm:$0xff]  }
  0x23   : > { %1765 = vmatmul.mubr.msk.bf16.gmra.mrb[4].mxu0 %vm530_vm2, %v1870_v15  ;;  %1797 = vmatmul.mubr.msk.bf16.gmra.mrb[4].mxu1 %vm530_vm2, %v1871_v16 }
  0x24   : > { %1768 = vmatprep.mubr.msk.bf16.mxu0 %vm530_vm2, %v1872_v17  ;;  %1800 = vmatprep.mubr.msk.bf16.mxu1 %vm530_vm2, %v1873_v18 }
  0x2b   : > { %1769 = vmatmul.mubr.msk.bf16.gmra.mrb[8].mxu0 %vm530_vm2, %v1874_v19  ;;  %1801 = vmatmul.mubr.msk.bf16.gmra.mrb[8].mxu1 %vm530_vm2, %v1875_v20 }
  0x2c   : > { %1772 = vmatprep.mubr.msk.bf16.mxu0 %vm530_vm2, %v1876_v21  ;;  %1804 = vmatprep.mubr.msk.bf16.mxu1 %vm530_vm2, %v1877_v22 }
  0x33   : > { %1773 = vmatmul.mubr.msk.bf16.gmra.mrb[12].mxu0 %vm530_vm2, %v1878_v23  ;;  %1805 = vmatmul.mubr.msk.bf16.gmra.mrb[12].mxu1 %vm530_vm2, %v1879_v24 }
  0x34   : > { %1776 = vmatprep.mubr.msk.bf16.mxu0 %vm530_vm2, %v1880_v25  ;;  %1808 = vmatprep.mubr.msk.bf16.mxu1 %vm530_vm2, %v1881_v26 }
  0x3b   : > { %1777 = vmatmul.mubr.msk.bf16.gmra.mrb[16].mxu0 %vm530_vm2, %v1882_v27  ;;  %1809 = vmatmul.mubr.msk.bf16.gmra.mrb[16].mxu1 %vm530_vm2, %v1883_v28 }
  0x3c   : > { %1780 = vmatprep.mubr.msk.bf16.mxu0 %vm530_vm2, %v1884_v29  ;;  %1812 = vmatprep.mubr.msk.bf16.mxu1 %vm530_vm2, %v1885_v30 }
  0x43   : > { %1781 = vmatmul.mubr.msk.bf16.gmra.mrb[20].mxu0 %vm530_vm2, %v1886_v31  ;;  %1813 = vmatmul.mubr.msk.bf16.gmra.mrb[20].mxu1 %vm530_vm2, %v1887_v32 }
  0x44   : > { %1784 = vmatprep.mubr.msk.bf16.mxu0 %vm530_vm2, %v1888_v33  ;;  %1816 = vmatprep.mubr.msk.bf16.mxu1 %vm530_vm2, %v1889_v34 }
  0x4b   : > { %1785 = vmatmul.mubr.msk.bf16.gmra.mrb[24].mxu0 %vm530_vm2, %v1890_v35  ;;  %1817 = vmatmul.mubr.msk.bf16.gmra.mrb[24].mxu1 %vm530_vm2, %v1891_v36 }
  0x4c   : > { %1788 = vmatprep.mubr.msk.bf16.mxu0 %vm530_vm2, %v1892_v37  ;;  %1820 = vmatprep.mubr.msk.bf16.mxu1 %vm530_vm2, %v1893_v38 }
  0x53   : > { %1789 = vmatmul.mubr.msk.bf16.gmra.mrb[28].mxu0 %vm530_vm2, %v1894_v39  ;;  %1821 = vmatmul.mubr.msk.bf16.gmra.mrb[28].mxu1 %vm530_vm2, %v1895_v40 }
  0xee   : > { %v1762_v42 = vpop.f32.mrb[0].mxu0  ;;  %v1794_v44 = vpop.f32.mrb[0].mxu1 }
  0xef   : > { %v932_v45 = vmul.f32 %v1762_v42, %v2059_v41  ;;  %v964_v46 = vmul.f32 %v1794_v44, %v2059_v41  ;;  %v668_v47 = vpop.f32.mrb[1].mxu0  ;;  %v796_v48 = vpop.f32.mrb[1].mxu1 }
  0xf0   : > { %v930_v49 = vmul.f32 %v2059_v41, %v668_v47  ;;  %v962_v50 = vmul.f32 %v2059_v41, %v796_v48  ;;  %v1763_v51 = vpop.f32.mrb[2].mxu0  ;;  %v1795_v52 = vpop.f32.mrb[2].mxu1 }
  0xf1   : > { %v1003_v53 = vadd.f32 %v2064_v43, %v932_v45  ;;  %v1035_v54 = vadd.f32 %v2064_v43, %v964_v46  ;;  %v933_v55 = vmul.f32 %v1763_v51, %v2059_v41  ;;  %v965_v56 = vmul.f32 %v1795_v52, %v2059_v41  ;;  %v671_v57 = vpop.f32.mrb[3].mxu0  ;;  %v799_v58 = vpop.f32.mrb[3].mxu1 }
  0xf2   : > { %v1001_v59 = vadd.f32 %v2064_v43, %v930_v49  ;;  %v1033_v60 = vadd.f32 %v2064_v43, %v962_v50  ;;  %v931_v61 = vmul.f32 %v2059_v41, %v671_v57  ;;  %v963_v62 = vmul.f32 %v2059_v41, %v799_v58 }
  0xf3   : > { %v1651_v63 = vpack.c.bf16 %v1003_v53, %v1003_v53  ;;  %v1683_v0 = vpack.c.bf16 %v1035_v54, %v1035_v54  ;;  %v1004_v1 = vadd.f32 %v2064_v43, %v933_v55  ;;  %v1036_v2 = vadd.f32 %v2064_v43, %v965_v56 }
  0xf4   : > { %v1649_v3 = vpack.c.bf16 %v1001_v59, %v1001_v59  ;;  %v1681_v4 = vpack.c.bf16 %v1033_v60, %v1033_v60  ;;  %v1002_v5 = vadd.f32 %v2064_v43, %v931_v61  ;;  %v1034_v6 = vadd.f32 %v2064_v43, %v963_v62 }
  0xf5   : > { %1324 = vst.msk [vmem:[%s2079_s14 + $0x8] sm:$0xf] %vm1321_vm3, %v1651_v63  ;;  %1356 = vst.msk [vmem:[%s2079_s14 + $0x88] sm:$0xf] %vm1321_vm3, %v1683_v0  ;;  %v1652_v7 = vpack.c.bf16 %v1004_v1, %v1004_v1  ;;  %v1684_v8 = vpack.c.bf16 %v1036_v2, %v1036_v2 }
  0xf6   : > { %1322 = vst.msk [vmem:[%s2079_s14] sm:$0xf] %vm1321_vm3, %v1649_v3  ;;  %1354 = vst.msk [vmem:[%s2079_s14 + $0x80] sm:$0xf] %vm1321_vm3, %v1681_v4  ;;  %v1650_v9 = vpack.c.bf16 %v1002_v5, %v1002_v5  ;;  %v1682_v10 = vpack.c.bf16 %v1034_v6, %v1034_v6  ;;  %v1766_v11 = vpop.f32.mrb[4].mxu0  ;;  %v1798_v12 = vpop.f32.mrb[4].mxu1 }
  0xf7   : > { %1325 = vst.msk [vmem:[%s2079_s14 + $0xc] sm:$0xf] %vm1321_vm3, %v1652_v7  ;;  %1357 = vst.msk [vmem:[%s2079_s14 + $0x8c] sm:$0xf] %vm1321_vm3, %v1684_v8  ;;  %v936_v13 = vmul.f32 %v1766_v11, %v2059_v41  ;;  %v968_v14 = vmul.f32 %v1798_v12, %v2059_v41  ;;  %v684_v15 = vpop.f32.mrb[5].mxu0  ;;  %v812_v16 = vpop.f32.mrb[5].mxu1 }
  0xf8   : > { %1323 = vst.msk [vmem:[%s2079_s14 + $0x4] sm:$0xf] %vm1321_vm3, %v1650_v9  ;;  %1355 = vst.msk [vmem:[%s2079_s14 + $0x84] sm:$0xf] %vm1321_vm3, %v1682_v10  ;;  %v934_v17 = vmul.f32 %v2059_v41, %v684_v15  ;;  %v966_v18 = vmul.f32 %v2059_v41, %v812_v16  ;;  %v1767_v19 = vpop.f32.mrb[6].mxu0  ;;  %v1799_v20 = vpop.f32.mrb[6].mxu1 }
  0xf9   : > { %v1007_v21 = vadd.f32 %v2064_v43, %v936_v13  ;;  %v1039_v22 = vadd.f32 %v2064_v43, %v968_v14  ;;  %v937_v23 = vmul.f32 %v1767_v19, %v2059_v41  ;;  %v969_v24 = vmul.f32 %v1799_v20, %v2059_v41  ;;  %v687_v25 = vpop.f32.mrb[7].mxu0  ;;  %v815_v26 = vpop.f32.mrb[7].mxu1 }
  0xfa   : > { %v1005_v27 = vadd.f32 %v2064_v43, %v934_v17  ;;  %v1037_v28 = vadd.f32 %v2064_v43, %v966_v18  ;;  %v935_v29 = vmul.f32 %v2059_v41, %v687_v25  ;;  %v967_v30 = vmul.f32 %v2059_v41, %v815_v26 }
  0xfb   : > { %v1655_v31 = vpack.c.bf16 %v1007_v21, %v1007_v21  ;;  %v1687_v32 = vpack.c.bf16 %v1039_v22, %v1039_v22  ;;  %v1008_v33 = vadd.f32 %v2064_v43, %v937_v23  ;;  %v1040_v34 = vadd.f32 %v2064_v43, %v969_v24 }
  0xfc   : > { %v1653_v35 = vpack.c.bf16 %v1005_v27, %v1005_v27  ;;  %v1685_v36 = vpack.c.bf16 %v1037_v28, %v1037_v28  ;;  %v1006_v37 = vadd.f32 %v2064_v43, %v935_v29  ;;  %v1038_v38 = vadd.f32 %v2064_v43, %v967_v30 }
  0xfd   : > { %1328 = vst.msk [vmem:[%s2079_s14 + $0x18] sm:$0xf] %vm1321_vm3, %v1655_v31  ;;  %1360 = vst.msk [vmem:[%s2079_s14 + $0x98] sm:$0xf] %vm1321_vm3, %v1687_v32  ;;  %v1656_v39 = vpack.c.bf16 %v1008_v33, %v1008_v33  ;;  %v1688_v40 = vpack.c.bf16 %v1040_v34, %v1040_v34 }
  0xfe   : > { %1326 = vst.msk [vmem:[%s2079_s14 + $0x10] sm:$0xf] %vm1321_vm3, %v1653_v35  ;;  %1358 = vst.msk [vmem:[%s2079_s14 + $0x90] sm:$0xf] %vm1321_vm3, %v1685_v36  ;;  %v1654_v42 = vpack.c.bf16 %v1006_v37, %v1006_v37  ;;  %v1686_v44 = vpack.c.bf16 %v1038_v38, %v1038_v38  ;;  %v1770_v45 = vpop.f32.mrb[8].mxu0  ;;  %v1802_v46 = vpop.f32.mrb[8].mxu1 }
  0xff   : > { %1329 = vst.msk [vmem:[%s2079_s14 + $0x1c] sm:$0xf] %vm1321_vm3, %v1656_v39  ;;  %1361 = vst.msk [vmem:[%s2079_s14 + $0x9c] sm:$0xf] %vm1321_vm3, %v1688_v40  ;;  %v940_v47 = vmul.f32 %v1770_v45, %v2059_v41  ;;  %v972_v48 = vmul.f32 %v1802_v46, %v2059_v41  ;;  %v700_v49 = vpop.f32.mrb[9].mxu0  ;;  %v828_v50 = vpop.f32.mrb[9].mxu1 }
 0x100   : > { %1327 = vst.msk [vmem:[%s2079_s14 + $0x14] sm:$0xf] %vm1321_vm3, %v1654_v42  ;;  %1359 = vst.msk [vmem:[%s2079_s14 + $0x94] sm:$0xf] %vm1321_vm3, %v1686_v44  ;;  %v938_v51 = vmul.f32 %v2059_v41, %v700_v49  ;;  %v970_v52 = vmul.f32 %v2059_v41, %v828_v50  ;;  %v1771_v53 = vpop.f32.mrb[10].mxu0  ;;  %v1803_v54 = vpop.f32.mrb[10].mxu1 }
 0x101   : > { %v1011_v55 = vadd.f32 %v2064_v43, %v940_v47  ;;  %v1043_v56 = vadd.f32 %v2064_v43, %v972_v48  ;;  %v941_v57 = vmul.f32 %v1771_v53, %v2059_v41  ;;  %v973_v58 = vmul.f32 %v1803_v54, %v2059_v41  ;;  %v703_v59 = vpop.f32.mrb[11].mxu0  ;;  %v831_v60 = vpop.f32.mrb[11].mxu1 }
 0x102   : > { %v1009_v61 = vadd.f32 %v2064_v43, %v938_v51  ;;  %v1041_v62 = vadd.f32 %v2064_v43, %v970_v52  ;;  %v939_v63 = vmul.f32 %v2059_v41, %v703_v59  ;;  %v971_v0 = vmul.f32 %v2059_v41, %v831_v60 }
 0x103   : > { %v1659_v1 = vpack.c.bf16 %v1011_v55, %v1011_v55  ;;  %v1691_v2 = vpack.c.bf16 %v1043_v56, %v1043_v56  ;;  %v1012_v3 = vadd.f32 %v2064_v43, %v941_v57  ;;  %v1044_v4 = vadd.f32 %v2064_v43, %v973_v58 }
 0x104   : > { %v1657_v5 = vpack.c.bf16 %v1009_v61, %v1009_v61  ;;  %v1689_v6 = vpack.c.bf16 %v1041_v62, %v1041_v62  ;;  %v1010_v7 = vadd.f32 %v2064_v43, %v939_v63  ;;  %v1042_v8 = vadd.f32 %v2064_v43, %v971_v0 }
 0x105   : > { %1332 = vst.msk [vmem:[%s2079_s14 + $0x28] sm:$0xf] %vm1321_vm3, %v1659_v1  ;;  %1364 = vst.msk [vmem:[%s2079_s14 + $0xa8] sm:$0xf] %vm1321_vm3, %v1691_v2  ;;  %v1660_v9 = vpack.c.bf16 %v1012_v3, %v1012_v3  ;;  %v1692_v10 = vpack.c.bf16 %v1044_v4, %v1044_v4 }
 0x106   : > { %1330 = vst.msk [vmem:[%s2079_s14 + $0x20] sm:$0xf] %vm1321_vm3, %v1657_v5  ;;  %1362 = vst.msk [vmem:[%s2079_s14 + $0xa0] sm:$0xf] %vm1321_vm3, %v1689_v6  ;;  %v1658_v11 = vpack.c.bf16 %v1010_v7, %v1010_v7  ;;  %v1690_v12 = vpack.c.bf16 %v1042_v8, %v1042_v8  ;;  %v1774_v13 = vpop.f32.mrb[12].mxu0  ;;  %v1806_v14 = vpop.f32.mrb[12].mxu1 }
 0x107   : > { %1333 = vst.msk [vmem:[%s2079_s14 + $0x2c] sm:$0xf] %vm1321_vm3, %v1660_v9  ;;  %1365 = vst.msk [vmem:[%s2079_s14 + $0xac] sm:$0xf] %vm1321_vm3, %v1692_v10  ;;  %v944_v15 = vmul.f32 %v1774_v13, %v2059_v41  ;;  %v976_v16 = vmul.f32 %v1806_v14, %v2059_v41  ;;  %v716_v17 = vpop.f32.mrb[13].mxu0  ;;  %v844_v18 = vpop.f32.mrb[13].mxu1 }
 0x108   : > { %1331 = vst.msk [vmem:[%s2079_s14 + $0x24] sm:$0xf] %vm1321_vm3, %v1658_v11  ;;  %1363 = vst.msk [vmem:[%s2079_s14 + $0xa4] sm:$0xf] %vm1321_vm3, %v1690_v12  ;;  %v942_v19 = vmul.f32 %v2059_v41, %v716_v17  ;;  %v974_v20 = vmul.f32 %v2059_v41, %v844_v18  ;;  %v1775_v21 = vpop.f32.mrb[14].mxu0  ;;  %v1807_v22 = vpop.f32.mrb[14].mxu1 }
 0x109   : > { %v1015_v23 = vadd.f32 %v2064_v43, %v944_v15  ;;  %v1047_v24 = vadd.f32 %v2064_v43, %v976_v16  ;;  %v945_v25 = vmul.f32 %v1775_v21, %v2059_v41  ;;  %v977_v26 = vmul.f32 %v1807_v22, %v2059_v41  ;;  %v719_v27 = vpop.f32.mrb[15].mxu0  ;;  %v847_v28 = vpop.f32.mrb[15].mxu1 }
 0x10a   : > { %v1013_v29 = vadd.f32 %v2064_v43, %v942_v19  ;;  %v1045_v30 = vadd.f32 %v2064_v43, %v974_v20  ;;  %v943_v31 = vmul.f32 %v2059_v41, %v719_v27  ;;  %v975_v32 = vmul.f32 %v2059_v41, %v847_v28 }
 0x10b   : > { %v1663_v33 = vpack.c.bf16 %v1015_v23, %v1015_v23  ;;  %v1695_v34 = vpack.c.bf16 %v1047_v24, %v1047_v24  ;;  %v1016_v35 = vadd.f32 %v2064_v43, %v945_v25  ;;  %v1048_v36 = vadd.f32 %v2064_v43, %v977_v26 }
 0x10c   : > { %v1661_v37 = vpack.c.bf16 %v1013_v29, %v1013_v29  ;;  %v1693_v38 = vpack.c.bf16 %v1045_v30, %v1045_v30  ;;  %v1014_v39 = vadd.f32 %v2064_v43, %v943_v31  ;;  %v1046_v40 = vadd.f32 %v2064_v43, %v975_v32 }
 0x10d   : > { %1336 = vst.msk [vmem:[%s2079_s14 + $0x38] sm:$0xf] %vm1321_vm3, %v1663_v33  ;;  %1368 = vst.msk [vmem:[%s2079_s14 + $0xb8] sm:$0xf] %vm1321_vm3, %v1695_v34  ;;  %v1664_v42 = vpack.c.bf16 %v1016_v35, %v1016_v35  ;;  %v1696_v44 = vpack.c.bf16 %v1048_v36, %v1048_v36 }
 0x10e   : > { %1334 = vst.msk [vmem:[%s2079_s14 + $0x30] sm:$0xf] %vm1321_vm3, %v1661_v37  ;;  %1366 = vst.msk [vmem:[%s2079_s14 + $0xb0] sm:$0xf] %vm1321_vm3, %v1693_v38  ;;  %v1662_v45 = vpack.c.bf16 %v1014_v39, %v1014_v39  ;;  %v1694_v46 = vpack.c.bf16 %v1046_v40, %v1046_v40  ;;  %v1778_v47 = vpop.f32.mrb[16].mxu0  ;;  %v1810_v48 = vpop.f32.mrb[16].mxu1 }
 0x10f   : > { %1337 = vst.msk [vmem:[%s2079_s14 + $0x3c] sm:$0xf] %vm1321_vm3, %v1664_v42  ;;  %1369 = vst.msk [vmem:[%s2079_s14 + $0xbc] sm:$0xf] %vm1321_vm3, %v1696_v44  ;;  %v948_v49 = vmul.f32 %v1778_v47, %v2059_v41  ;;  %v980_v50 = vmul.f32 %v1810_v48, %v2059_v41  ;;  %v732_v51 = vpop.f32.mrb[17].mxu0  ;;  %v860_v52 = vpop.f32.mrb[17].mxu1 }
 0x110   : > { %1335 = vst.msk [vmem:[%s2079_s14 + $0x34] sm:$0xf] %vm1321_vm3, %v1662_v45  ;;  %1367 = vst.msk [vmem:[%s2079_s14 + $0xb4] sm:$0xf] %vm1321_vm3, %v1694_v46  ;;  %v946_v53 = vmul.f32 %v2059_v41, %v732_v51  ;;  %v978_v54 = vmul.f32 %v2059_v41, %v860_v52  ;;  %v1779_v55 = vpop.f32.mrb[18].mxu0  ;;  %v1811_v56 = vpop.f32.mrb[18].mxu1 }
 0x111   : > { %v1019_v57 = vadd.f32 %v2064_v43, %v948_v49  ;;  %v1051_v58 = vadd.f32 %v2064_v43, %v980_v50  ;;  %v949_v59 = vmul.f32 %v1779_v55, %v2059_v41  ;;  %v981_v60 = vmul.f32 %v1811_v56, %v2059_v41  ;;  %v735_v61 = vpop.f32.mrb[19].mxu0  ;;  %v863_v62 = vpop.f32.mrb[19].mxu1 }
 0x112   : > { %v1017_v63 = vadd.f32 %v2064_v43, %v946_v53  ;;  %v1049_v0 = vadd.f32 %v2064_v43, %v978_v54  ;;  %v947_v1 = vmul.f32 %v2059_v41, %v735_v61  ;;  %v979_v2 = vmul.f32 %v2059_v41, %v863_v62 }
 0x113   : > { %v1667_v3 = vpack.c.bf16 %v1019_v57, %v1019_v57  ;;  %v1699_v4 = vpack.c.bf16 %v1051_v58, %v1051_v58  ;;  %v1020_v5 = vadd.f32 %v2064_v43, %v949_v59  ;;  %v1052_v6 = vadd.f32 %v2064_v43, %v981_v60 }
 0x114   : > { %v1665_v7 = vpack.c.bf16 %v1017_v63, %v1017_v63  ;;  %v1697_v8 = vpack.c.bf16 %v1049_v0, %v1049_v0  ;;  %v1018_v9 = vadd.f32 %v2064_v43, %v947_v1  ;;  %v1050_v10 = vadd.f32 %v2064_v43, %v979_v2 }
 0x115   : > { %1340 = vst.msk [vmem:[%s2079_s14 + $0x48] sm:$0xf] %vm1321_vm3, %v1667_v3  ;;  %1372 = vst.msk [vmem:[%s2079_s14 + $0xc8] sm:$0xf] %vm1321_vm3, %v1699_v4  ;;  %v1668_v11 = vpack.c.bf16 %v1020_v5, %v1020_v5  ;;  %v1700_v12 = vpack.c.bf16 %v1052_v6, %v1052_v6 }
 0x116   : > { %1338 = vst.msk [vmem:[%s2079_s14 + $0x40] sm:$0xf] %vm1321_vm3, %v1665_v7  ;;  %1370 = vst.msk [vmem:[%s2079_s14 + $0xc0] sm:$0xf] %vm1321_vm3, %v1697_v8  ;;  %v1666_v13 = vpack.c.bf16 %v1018_v9, %v1018_v9  ;;  %v1698_v14 = vpack.c.bf16 %v1050_v10, %v1050_v10  ;;  %v1782_v15 = vpop.f32.mrb[20].mxu0  ;;  %v1814_v16 = vpop.f32.mrb[20].mxu1 }
 0x117   : > { %1341 = vst.msk [vmem:[%s2079_s14 + $0x4c] sm:$0xf] %vm1321_vm3, %v1668_v11  ;;  %1373 = vst.msk [vmem:[%s2079_s14 + $0xcc] sm:$0xf] %vm1321_vm3, %v1700_v12  ;;  %v952_v17 = vmul.f32 %v1782_v15, %v2059_v41  ;;  %v984_v18 = vmul.f32 %v1814_v16, %v2059_v41  ;;  %v748_v19 = vpop.f32.mrb[21].mxu0  ;;  %v876_v20 = vpop.f32.mrb[21].mxu1 }
 0x118   : > { %1339 = vst.msk [vmem:[%s2079_s14 + $0x44] sm:$0xf] %vm1321_vm3, %v1666_v13  ;;  %1371 = vst.msk [vmem:[%s2079_s14 + $0xc4] sm:$0xf] %vm1321_vm3, %v1698_v14  ;;  %v950_v21 = vmul.f32 %v2059_v41, %v748_v19  ;;  %v982_v22 = vmul.f32 %v2059_v41, %v876_v20  ;;  %v1783_v23 = vpop.f32.mrb[22].mxu0  ;;  %v1815_v24 = vpop.f32.mrb[22].mxu1 }
 0x119   : > { %v1023_v25 = vadd.f32 %v2064_v43, %v952_v17  ;;  %v1055_v26 = vadd.f32 %v2064_v43, %v984_v18  ;;  %v953_v27 = vmul.f32 %v1783_v23, %v2059_v41  ;;  %v985_v28 = vmul.f32 %v1815_v24, %v2059_v41  ;;  %v751_v29 = vpop.f32.mrb[23].mxu0  ;;  %v879_v30 = vpop.f32.mrb[23].mxu1 }
 0x11a   : > { %v1021_v31 = vadd.f32 %v2064_v43, %v950_v21  ;;  %v1053_v32 = vadd.f32 %v2064_v43, %v982_v22  ;;  %v951_v33 = vmul.f32 %v2059_v41, %v751_v29  ;;  %v983_v34 = vmul.f32 %v2059_v41, %v879_v30 }
 0x11b   : > { %v1671_v35 = vpack.c.bf16 %v1023_v25, %v1023_v25  ;;  %v1703_v36 = vpack.c.bf16 %v1055_v26, %v1055_v26  ;;  %v1024_v37 = vadd.f32 %v2064_v43, %v953_v27  ;;  %v1056_v38 = vadd.f32 %v2064_v43, %v985_v28 }
 0x11c   : > { %v1669_v39 = vpack.c.bf16 %v1021_v31, %v1021_v31  ;;  %v1701_v40 = vpack.c.bf16 %v1053_v32, %v1053_v32  ;;  %v1022_v42 = vadd.f32 %v2064_v43, %v951_v33  ;;  %v1054_v44 = vadd.f32 %v2064_v43, %v983_v34 }
 0x11d   : > { %1344 = vst.msk [vmem:[%s2079_s14 + $0x58] sm:$0xf] %vm1321_vm3, %v1671_v35  ;;  %1376 = vst.msk [vmem:[%s2079_s14 + $0xd8] sm:$0xf] %vm1321_vm3, %v1703_v36  ;;  %v1672_v45 = vpack.c.bf16 %v1024_v37, %v1024_v37  ;;  %v1704_v46 = vpack.c.bf16 %v1056_v38, %v1056_v38 }
 0x11e   : > { %1342 = vst.msk [vmem:[%s2079_s14 + $0x50] sm:$0xf] %vm1321_vm3, %v1669_v39  ;;  %1374 = vst.msk [vmem:[%s2079_s14 + $0xd0] sm:$0xf] %vm1321_vm3, %v1701_v40  ;;  %v1670_v47 = vpack.c.bf16 %v1022_v42, %v1022_v42  ;;  %v1702_v48 = vpack.c.bf16 %v1054_v44, %v1054_v44  ;;  %v1786_v49 = vpop.f32.mrb[24].mxu0  ;;  %v1818_v50 = vpop.f32.mrb[24].mxu1 }
 0x11f   : > { %1345 = vst.msk [vmem:[%s2079_s14 + $0x5c] sm:$0xf] %vm1321_vm3, %v1672_v45  ;;  %1377 = vst.msk [vmem:[%s2079_s14 + $0xdc] sm:$0xf] %vm1321_vm3, %v1704_v46  ;;  %v956_v51 = vmul.f32 %v1786_v49, %v2059_v41  ;;  %v988_v52 = vmul.f32 %v1818_v50, %v2059_v41  ;;  %v764_v53 = vpop.f32.mrb[25].mxu0  ;;  %v892_v54 = vpop.f32.mrb[25].mxu1 }
 0x120   : > { %1343 = vst.msk [vmem:[%s2079_s14 + $0x54] sm:$0xf] %vm1321_vm3, %v1670_v47  ;;  %1375 = vst.msk [vmem:[%s2079_s14 + $0xd4] sm:$0xf] %vm1321_vm3, %v1702_v48  ;;  %v954_v55 = vmul.f32 %v2059_v41, %v764_v53  ;;  %v986_v56 = vmul.f32 %v2059_v41, %v892_v54  ;;  %v1787_v57 = vpop.f32.mrb[26].mxu0  ;;  %v1819_v58 = vpop.f32.mrb[26].mxu1 }
 0x121   : > { %v1027_v59 = vadd.f32 %v2064_v43, %v956_v51  ;;  %v1059_v60 = vadd.f32 %v2064_v43, %v988_v52  ;;  %v957_v61 = vmul.f32 %v1787_v57, %v2059_v41  ;;  %v989_v62 = vmul.f32 %v1819_v58, %v2059_v41  ;;  %v767_v63 = vpop.f32.mrb[27].mxu0  ;;  %v895_v0 = vpop.f32.mrb[27].mxu1 }
 0x122   : > { %v1025_v1 = vadd.f32 %v2064_v43, %v954_v55  ;;  %v1057_v2 = vadd.f32 %v2064_v43, %v986_v56  ;;  %v955_v3 = vmul.f32 %v2059_v41, %v767_v63  ;;  %v987_v4 = vmul.f32 %v2059_v41, %v895_v0 }
 0x123   : > { %v1675_v5 = vpack.c.bf16 %v1027_v59, %v1027_v59  ;;  %v1707_v6 = vpack.c.bf16 %v1059_v60, %v1059_v60  ;;  %v1028_v7 = vadd.f32 %v2064_v43, %v957_v61  ;;  %v1060_v8 = vadd.f32 %v2064_v43, %v989_v62 }
 0x124   : > { %v1673_v9 = vpack.c.bf16 %v1025_v1, %v1025_v1  ;;  %v1705_v10 = vpack.c.bf16 %v1057_v2, %v1057_v2  ;;  %v1026_v11 = vadd.f32 %v2064_v43, %v955_v3  ;;  %v1058_v12 = vadd.f32 %v2064_v43, %v987_v4 }
 0x125   : > { %1348 = vst.msk [vmem:[%s2079_s14 + $0x68] sm:$0xf] %vm1321_vm3, %v1675_v5  ;;  %1380 = vst.msk [vmem:[%s2079_s14 + $0xe8] sm:$0xf] %vm1321_vm3, %v1707_v6  ;;  %v1676_v13 = vpack.c.bf16 %v1028_v7, %v1028_v7  ;;  %v1708_v14 = vpack.c.bf16 %v1060_v8, %v1060_v8 }
 0x126   : > { %1346 = vst.msk [vmem:[%s2079_s14 + $0x60] sm:$0xf] %vm1321_vm3, %v1673_v9  ;;  %1378 = vst.msk [vmem:[%s2079_s14 + $0xe0] sm:$0xf] %vm1321_vm3, %v1705_v10  ;;  %v1674_v15 = vpack.c.bf16 %v1026_v11, %v1026_v11  ;;  %v1706_v16 = vpack.c.bf16 %v1058_v12, %v1058_v12  ;;  %v1790_v17 = vpop.f32.mrb[28].mxu0  ;;  %v1822_v18 = vpop.f32.mrb[28].mxu1 }
 0x127   : > { %1349 = vst.msk [vmem:[%s2079_s14 + $0x6c] sm:$0xf] %vm1321_vm3, %v1676_v13  ;;  %1381 = vst.msk [vmem:[%s2079_s14 + $0xec] sm:$0xf] %vm1321_vm3, %v1708_v14  ;;  %v960_v19 = vmul.f32 %v1790_v17, %v2059_v41  ;;  %v992_v20 = vmul.f32 %v1822_v18, %v2059_v41  ;;  %v780_v21 = vpop.f32.mrb[29].mxu0  ;;  %v908_v22 = vpop.f32.mrb[29].mxu1 }
 0x128   : > { %1347 = vst.msk [vmem:[%s2079_s14 + $0x64] sm:$0xf] %vm1321_vm3, %v1674_v15  ;;  %1379 = vst.msk [vmem:[%s2079_s14 + $0xe4] sm:$0xf] %vm1321_vm3, %v1706_v16  ;;  %v958_v23 = vmul.f32 %v2059_v41, %v780_v21  ;;  %v990_v24 = vmul.f32 %v2059_v41, %v908_v22  ;;  %v1791_v25 = vpop.f32.mrb[30].mxu0  ;;  %v1823_v26 = vpop.f32.mrb[30].mxu1 }
 0x129   : > { %v1031_v27 = vadd.f32 %v2064_v43, %v960_v19  ;;  %v1063_v28 = vadd.f32 %v2064_v43, %v992_v20  ;;  %v961_v29 = vmul.f32 %v1791_v25, %v2059_v41  ;;  %v993_v30 = vmul.f32 %v1823_v26, %v2059_v41  ;;  %v783_v31 = vpop.f32.mrb[31].mxu0  ;;  %v911_v32 = vpop.f32.mrb[31].mxu1 }
 0x12a   : > { %v1029_v33 = vadd.f32 %v2064_v43, %v958_v23  ;;  %v1061_v34 = vadd.f32 %v2064_v43, %v990_v24  ;;  %v959_v35 = vmul.f32 %v2059_v41, %v783_v31  ;;  %v991_v36 = vmul.f32 %v2059_v41, %v911_v32 }
 0x12b   : > { %v1679_v37 = vpack.c.bf16 %v1031_v27, %v1031_v27  ;;  %v1711_v38 = vpack.c.bf16 %v1063_v28, %v1063_v28  ;;  %v1032_v39 = vadd.f32 %v2064_v43, %v961_v29  ;;  %v1064_v40 = vadd.f32 %v2064_v43, %v993_v30 }
 0x12c   : > { %v1677_v42 = vpack.c.bf16 %v1029_v33, %v1029_v33  ;;  %v1709_v44 = vpack.c.bf16 %v1061_v34, %v1061_v34  ;;  %v1030_v45 = vadd.f32 %v2064_v43, %v959_v35  ;;  %v1062_v46 = vadd.f32 %v2064_v43, %v991_v36 }
 0x12d   : > { %1352 = vst.msk [vmem:[%s2079_s14 + $0x78] sm:$0xf] %vm1321_vm3, %v1679_v37  ;;  %1384 = vst.msk [vmem:[%s2079_s14 + $0xf8] sm:$0xf] %vm1321_vm3, %v1711_v38  ;;  %v1680_v41 = vpack.c.bf16 %v1032_v39, %v1032_v39  ;;  %v1712_v47 = vpack.c.bf16 %v1064_v40, %v1064_v40 }
 0x12e   : > { %1350 = vst.msk [vmem:[%s2079_s14 + $0x70] sm:$0xf] %vm1321_vm3, %v1677_v42  ;;  %1382 = vst.msk [vmem:[%s2079_s14 + $0xf0] sm:$0xf] %vm1321_vm3, %v1709_v44  ;;  %v1678_v48 = vpack.c.bf16 %v1030_v45, %v1030_v45  ;;  %v1710_v49 = vpack.c.bf16 %v1062_v46, %v1062_v46 }
 0x12f   : > { %1353 = vst.msk [vmem:[%s2079_s14 + $0x7c] sm:$0xf] %vm1321_vm3, %v1680_v41  ;;  %1385 = vst.msk [vmem:[%s2079_s14 + $0xfc] sm:$0xf] %vm1321_vm3, %v1712_v47 }
 0x130   : > { %1351 = vst.msk [vmem:[%s2079_s14 + $0x74] sm:$0xf] %vm1321_vm3, %v1678_v48  ;;  %1383 = vst.msk [vmem:[%s2079_s14 + $0xf4] sm:$0xf] %vm1321_vm3, %v1710_v49 }
 0x131 PF: > { %s14_s17 = sadd.s32 1, %s1918_s17   ;;  %s2343_s15 = smov %s1914_s16 }
 0x132   : > { %p11_p5 = scmp.ge.s32.totalorder %s14_s17, 10   ;;  %s2344_s16 = smov %s2346_s18 }
 0x134   :  { %13 = sbr.rel (!%p11_p5) target bundleno = 2 (0x2), region = 75 }

</bundles_post_ra>
